<compile_context>
chip_gen: v7x
topology: tpu7x:2x2x1
jax: 0.10.0
libtpu: 0.0.40
codegen_flags: <defaults>
</compile_context>

<pallas_src>
import functools

import jax
import jax.numpy as jnp
from jax import lax
from jax.experimental import pallas as pl
from jax.experimental.pallas import tpu as pltpu


_INV_SQRT2 = 0.7071067811865476


def _round_up(x, m):
    return ((x + m - 1) // m) * m


def _gelu(h_f32, approximate):
    if approximate:
        # tanh-approx GELU -> EUP slot (nearly free next to MXU work).
        return jax.nn.gelu(h_f32, approximate=True)
    # PyTorch nn.GELU default = exact erf formulation.
    return 0.5 * h_f32 * (1.0 + lax.erf(h_f32 * _INV_SQRT2))


def _vmem_capacity_bytes():
    try:
        return int(pltpu.get_tpu_info().vmem_capacity_bytes)
    except Exception:
        return 128 << 20  # conservative v5e/v6e default


# --------------------------------------------------------------------------
# Kernels
# --------------------------------------------------------------------------

def mlp_resident_kernel(x_ref, w1_ref, b1_ref, w2_ref, b2_ref, o_ref, *, approximate):
    # Weights fully resident in VMEM; single grid axis over row tiles.
    x = x_ref[...].astype(w1_ref.dtype)
    h = jnp.dot(x, w1_ref[...], preferred_element_type=jnp.float32)
    h = h + b1_ref[...]
    g = _gelu(h, approximate)
    out = jnp.dot(g.astype(w2_ref.dtype), w2_ref[...],
                  preferred_element_type=jnp.float32)
    o_ref[...] = (out + b2_ref[...]).astype(o_ref.dtype)


def mlp_streamed_kernel(x_ref, w1_ref, b1_ref, w2_ref, b2_ref, o_ref, acc_ref,
                        *, approximate):
    # Grid = (row tiles, hidden tiles); hidden is a reduction into acc_ref (f32).
    j = pl.program_id(1)

    @pl.when(j == 0)
    def _init():
        acc_ref[...] = jnp.zeros_like(acc_ref)

    x = x_ref[...].astype(w1_ref.dtype)
    h = jnp.dot(x, w1_ref[...], preferred_element_type=jnp.float32)
    h = h + b1_ref[...]
    g = _gelu(h, approximate)
    acc_ref[...] += jnp.dot(g.astype(w2_ref.dtype), w2_ref[...],
                            preferred_element_type=jnp.float32)

    @pl.when(j == pl.num_programs(1) - 1)
    def _finalize():
        o_ref[...] = (acc_ref[...] + b2_ref[...]).astype(o_ref.dtype)


# --------------------------------------------------------------------------
# Parameter preparation (pad + cast once; hoisted out of the forward pass)
# --------------------------------------------------------------------------

def prepare_params(w1, b1, w2, b2, *, compute_dtype=jnp.bfloat16,
                   th=None, force_streamed=False):
    """w1: (E, 6E), b1: (6E,), w2: (6E, E), b2: (E,)."""
    E, H = w1.shape
    vmem_phys = _vmem_capacity_bytes()
    # v7x (64 MiB physical): ~51 MiB cap. v5e/v6e (128 MiB): 100 MiB cap.
    cap = min(int(0.8 * vmem_phys), 100 << 20)
    big_vmem = vmem_phys >= (96 << 20)

    th_eff = th if th is not None else (1024 if big_vmem else 512)
    th_eff = max(128, min(_round_up(th_eff, 128), _round_up(H, 128)))

    E_pad = _round_up(E, 128)
    compute_dtype = jnp.dtype(compute_dtype)
    bs_c = compute_dtype.itemsize

    # Weight-resident feasibility (assume double-buffered copies for safety).
    H_pad_res = _round_up(H, 128)
    w_bytes_res = 2 * 2 * E_pad * H_pad_res * bs_c
    resident = (not force_streamed) and (w_bytes_res <= int(0.5 * cap))

    H_pad = H_pad_res if resident else _round_up(H, th_eff)

    w1p = jnp.pad(w1, ((0, E_pad - E), (0, H_pad - H))).astype(compute_dtype)
    w2p = jnp.pad(w2, ((0, H_pad - H), (0, E_pad - E))).astype(compute_dtype)
    b1p = jnp.pad(b1.astype(jnp.float32), (0, H_pad - H)).reshape(1, H_pad)
    b2p = jnp.pad(b2.astype(jnp.float32), (0, E_pad - E)).reshape(1, E_pad)

    return dict(E=E, H=H, E_pad=E_pad, H_pad=H_pad, th=th_eff,
                resident=resident, cap=cap, big_vmem=big_vmem,
                compute_dtype=compute_dtype,
                w1=w1p, b1=b1p, w2=w2p, b2=b2p)


# --------------------------------------------------------------------------
# Forward pass
# --------------------------------------------------------------------------

def forward_layer(x, params, *, tm=None, approximate_gelu=False):
    """x: (B, T, E). params: output of prepare_params."""
    B, T, E = x.shape
    assert E == params["E"], "embed size mismatch"
    M = B * T
    out_dtype = x.dtype
    E_pad, H_pad, th = params["E_pad"], params["H_pad"], params["th"]
    cap = params["cap"]
    bs_c = params["compute_dtype"].itemsize
    bs_x = jnp.dtype(out_dtype).itemsize

    # Sublane packing of the activation dtype (bf16 packs 16 rows / vreg).
    row_align = 16 if bs_x == 2 else (32 if bs_x == 1 else 8)

    if tm is None:
        # v5e/v6e: large row tile (HBM roofline crossover ~650 bf16 flops/byte);
        # v7x: smaller tile under the 64 MiB VMEM, crossover ~311.
        tm = 768 if params["big_vmem"] else 512

    tm_eff = min(tm, _round_up(M, row_align))
    # Megacore: keep >= 2 row tiles when there are enough rows (v7x has 2 TCs).
    if M >= 2 * row_align and _round_up(M, row_align) <= tm_eff:
        tm_eff = _round_up((M + 1) // 2, row_align)
    tm_eff = max(row_align, _round_up(tm_eff, row_align))

    if params["resident"]:
        def footprint(tm_):
            v = 2 * 2 * E_pad * H_pad * bs_c       # W1 + W2 (x2 buffers, worst case)
            v += 2 * tm_ * E_pad * bs_x            # x tiles (double-buffered)
            v += 2 * tm_ * E_pad * bs_x            # out tiles
            v += 2 * tm_ * H_pad * 4               # h / gelu f32 temporaries
            v += 2 * tm_ * E_pad * 4               # 2nd matmul f32 result
            v += 2 * (H_pad + E_pad) * 4           # biases
            return v
    else:
        def footprint(tm_):
            v = 2 * tm_ * E_pad * bs_x             # x tiles
            v += 2 * E_pad * th * bs_c             # W1 tile
            v += 2 * th * E_pad * bs_c             # W2 tile
            v += 2 * (th + E_pad) * 4              # biases
            v += 2 * tm_ * E_pad * bs_x            # out tiles
            v += tm_ * E_pad * 4                   # f32 accumulator scratch
            v += 2 * tm_ * th * 4                  # h / gelu temporaries
            return v

    while footprint(tm_eff) > int(0.75 * cap) and tm_eff > row_align:
        tm_eff = max(row_align, _round_up(tm_eff // 2, row_align))

    M_pad = _round_up(M, tm_eff)
    x2 = jnp.pad(x.reshape(M, E), ((0, M_pad - M), (0, E_pad - E)))

    vmem_limit = min(cap, max(32 << 20, int(1.4 * footprint(tm_eff)) + (4 << 20)))

    if params["resident"]:
        grid = (M_pad // tm_eff,)
        out = pl.pallas_call(
            functools.partial(mlp_resident_kernel, approximate=approximate_gelu),
            out_shape=jax.ShapeDtypeStruct((M_pad, E_pad), out_dtype),
            grid_spec=pltpu.PrefetchScalarGridSpec(
                num_scalar_prefetch=0,
                grid=grid,
                in_specs=[
                    pl.BlockSpec((tm_eff, E_pad), lambda i: (i, 0)),   # x rows
                    pl.BlockSpec((E_pad, H_pad), lambda i: (0, 0)),    # W1 (resident)
                    pl.BlockSpec((1, H_pad), lambda i: (0, 0)),        # b1
                    pl.BlockSpec((H_pad, E_pad), lambda i: (0, 0)),    # W2 (resident)
                    pl.BlockSpec((1, E_pad), lambda i: (0, 0)),        # b2
                ],
                out_specs=pl.BlockSpec((tm_eff, E_pad), lambda i: (i, 0)),
            ),
            compiler_params=pltpu.CompilerParams(
                dimension_semantics=("parallel",),
                vmem_limit_bytes=vmem_limit,
            ),
        )(x2, params["w1"], params["b1"], params["w2"], params["b2"])
    else:
        grid = (M_pad // tm_eff, H_pad // th)
        out = pl.pallas_call(
            functools.partial(mlp_streamed_kernel, approximate=approximate_gelu),
            out_shape=jax.ShapeDtypeStruct((M_pad, E_pad), out_dtype),
            grid_spec=pltpu.PrefetchScalarGridSpec(
                num_scalar_prefetch=0,
                grid=grid,
                in_specs=[
                    pl.BlockSpec((tm_eff, E_pad), lambda i, j: (i, 0)),  # x rows
                    pl.BlockSpec((E_pad, th), lambda i, j: (0, j)),      # W1 tile
                    pl.BlockSpec((1, th), lambda i, j: (0, j)),          # b1 tile
                    pl.BlockSpec((th, E_pad), lambda i, j: (j, 0)),      # W2 tile
                    pl.BlockSpec((1, E_pad), lambda i, j: (0, 0)),       # b2
                ],
                out_specs=pl.BlockSpec((tm_eff, E_pad), lambda i, j: (i, 0)),
                scratch_shapes=[pltpu.VMEM((tm_eff, E_pad), jnp.float32)],
            ),
            compiler_params=pltpu.CompilerParams(
                dimension_semantics=("parallel", "arbitrary"),
                vmem_limit_bytes=vmem_limit,
            ),
        )(x2, params["w1"], params["b1"], params["w2"], params["b2"])

    return out[:M, :E].reshape(B, T, E)


def init_params(key, embed_size, dtype=jnp.float32):
    """nn.Linear-style init (PyTorch stores W as (out,in); we keep (in,out))."""
    hidden = 6 * embed_size
    k1, k2, k3, k4 = jax.random.split(key, 4)
    lim1 = 1.0 / jnp.sqrt(embed_size)
    lim2 = 1.0 / jnp.sqrt(hidden)
    w1 = jax.random.uniform(k1, (embed_size, hidden), dtype, -lim1, lim1)
    b1 = jax.random.uniform(k2, (hidden,), dtype, -lim1, lim1)
    w2 = jax.random.uniform(k3, (hidden, embed_size), dtype, -lim2, lim2)
    b2 = jax.random.uniform(k4, (embed_size,), dtype, -lim2, lim2)
    return w1, b1, w2, b2


if __name__ == "__main__":
    B, T, E = 2, 8, 32
    key = jax.random.PRNGKey(0)
    kx, kp = jax.random.split(key)
    x = jax.random.normal(kx, (B, T, E), jnp.float32)
    w1, b1, w2, b2 = init_params(kp, E)

    # Plain-JAX reference (exact-erf GELU, f32, dropout = identity at inference).
    h_ref = jax.nn.gelu(x.reshape(-1, E) @ w1 + b1, approximate=False)
    y_ref = (h_ref @ w2 + b2).reshape(B, T, E)

    # Fast path: bf16 MXU matmuls (f32 accumulation), weight-resident variant.
    params_bf16 = prepare_params(w1, b1, w2, b2, compute_dtype=jnp.bfloat16)
    y = forward_layer(x, params_bf16)
    jax.block_until_ready(y)
    assert jnp.allclose(y, y_ref, atol=5e-2, rtol=5e-2), "bf16 path mismatch vs reference"

    # Exactness check: f32 compute, streamed (hidden-reduction) variant.
    params_f32 = prepare_params(w1, b1, w2, b2, compute_dtype=jnp.float32,
                                th=128, force_streamed=True)
    y32 = forward_layer(x, params_f32)
    jax.block_until_ready(y32)
    assert jnp.allclose(y32, y_ref, atol=1e-5, rtol=1e-5), "f32 streamed path mismatch"

    print("KERNEL_OK")
</pallas_src>

<mosaic_0001>
module attributes {stable_mosaic.version = 11 : i64} {
  func.func @mlp_resident_kernel(%arg0: i32, %arg1: memref<8x128xf32, #tpu.memory_space<vmem>>, %arg2: memref<128x256xbf16, #tpu.memory_space<vmem>>, %arg3: memref<1x256xf32, #tpu.memory_space<vmem>>, %arg4: memref<256x128xbf16, #tpu.memory_space<vmem>>, %arg5: memref<1x128xf32, #tpu.memory_space<vmem>>, %arg6: memref<8x128xf32, #tpu.memory_space<vmem>>) attributes {dimension_semantics = [#tpu.dimension_semantics<parallel>], iteration_bounds = array<i64: 2>, scalar_prefetch = 0 : i64, scratch_operands = 0 : i64, tpu.core_type = #tpu.core_type<tc>, window_params = [{transform_indices = @transform_0, window_bounds = array<i64: 8, 128>}, {pipeline_mode = #tpu.pipeline_mode<synchronous>, transform_indices = @transform_1, window_bounds = array<i64: 128, 256>}, {pipeline_mode = #tpu.pipeline_mode<synchronous>, transform_indices = @transform_2, window_bounds = array<i64: 1, 256>}, {pipeline_mode = #tpu.pipeline_mode<synchronous>, transform_indices = @transform_3, window_bounds = array<i64: 256, 128>}, {pipeline_mode = #tpu.pipeline_mode<synchronous>, transform_indices = @transform_4, window_bounds = array<i64: 1, 128>}, {transform_indices = @transform_5, window_bounds = array<i64: 8, 128>}]} {
    %c0 = arith.constant 0 : index
    %c0_0 = arith.constant 0 : index
    %0 = vector.load %arg1[%c0, %c0_0] : memref<8x128xf32, #tpu.memory_space<vmem>>, vector<8x128xf32>
    %1 = arith.truncf %0 : vector<8x128xf32> to vector<8x128xbf16>
    %c0_1 = arith.constant 0 : index
    %c0_2 = arith.constant 0 : index
    %2 = vector.load %arg2[%c0_1, %c0_2] : memref<128x256xbf16, #tpu.memory_space<vmem>>, vector<128x256xbf16>
    %cst = arith.constant dense<0.000000e+00> : vector<8x256xf32>
    %3 = tpu.matmul %1, %2, %cst {dimension_numbers = #tpu.dot_dimension_numbers<[1], [0], [0], [1], [0, 0, 1, 1], [], []>} : vector<8x128xbf16>, vector<128x256xbf16>, vector<8x256xf32> -> vector<8x256xf32>
    %c0_3 = arith.constant 0 : index
    %c0_4 = arith.constant 0 : index
    %4 = vector.load %arg3[%c0_3, %c0_4] : memref<1x256xf32, #tpu.memory_space<vmem>>, vector<1x256xf32>
    %5 = vector.broadcast %4 : vector<1x256xf32> to vector<8x256xf32>
    %6 = arith.addf %3, %5 : vector<8x256xf32>
    %cst_5 = arith.constant 5.000000e-01 : f32
    %7 = vector.broadcast %cst_5 : f32 to vector<8x256xf32>
    %8 = arith.mulf %7, %6 : vector<8x256xf32>
    %cst_6 = arith.constant 0.707106769 : f32
    %9 = vector.broadcast %cst_6 : f32 to vector<8x256xf32>
    %10 = arith.mulf %6, %9 : vector<8x256xf32>
    %11 = math.erf %10 : vector<8x256xf32>
    %cst_7 = arith.constant 1.000000e+00 : f32
    %12 = vector.broadcast %cst_7 : f32 to vector<8x256xf32>
    %13 = arith.addf %12, %11 : vector<8x256xf32>
    %14 = arith.mulf %8, %13 : vector<8x256xf32>
    %15 = arith.truncf %14 : vector<8x256xf32> to vector<8x256xbf16>
    %c0_8 = arith.constant 0 : index
    %c0_9 = arith.constant 0 : index
    %16 = vector.load %arg4[%c0_8, %c0_9] : memref<256x128xbf16, #tpu.memory_space<vmem>>, vector<256x128xbf16>
    %cst_10 = arith.constant dense<0.000000e+00> : vector<8x128xf32>
    %17 = tpu.matmul %15, %16, %cst_10 {dimension_numbers = #tpu.dot_dimension_numbers<[1], [0], [0], [1], [0, 0, 1, 1], [], []>} : vector<8x256xbf16>, vector<256x128xbf16>, vector<8x128xf32> -> vector<8x128xf32>
    %c0_11 = arith.constant 0 : index
    %c0_12 = arith.constant 0 : index
    %18 = vector.load %arg5[%c0_11, %c0_12] : memref<1x128xf32, #tpu.memory_space<vmem>>, vector<1x128xf32>
    %19 = vector.broadcast %18 : vector<1x128xf32> to vector<8x128xf32>
    %20 = arith.addf %17, %19 : vector<8x128xf32>
    %c0_13 = arith.constant 0 : index
    %c0_14 = arith.constant 0 : index
    %21 = vector.load %arg6[%c0_13, %c0_14] : memref<8x128xf32, #tpu.memory_space<vmem>>, vector<8x128xf32>
    tpu.vector_store %arg6[%c0_13, %c0_14], %20 {strides = array<i32>} : memref<8x128xf32, #tpu.memory_space<vmem>>, vector<8x128xf32>,
    return
  }
  func.func @transform_0(%arg0: i32) -> (i32, i32) {
    %c0_i32 = arith.constant 0 : i32
    %c0_i32_0 = arith.constant 0 : i32
    return %arg0, %c0_i32 : i32, i32
  }
  func.func @transform_1(%arg0: i32) -> (i32, i32) {
    %c0_i32 = arith.constant 0 : i32
    %c0_i32_0 = arith.constant 0 : i32
    %c0_i32_1 = arith.constant 0 : i32
    return %c0_i32, %c0_i32_0 : i32, i32
  }
  func.func @transform_2(%arg0: i32) -> (i32, i32) {
    %c0_i32 = arith.constant 0 : i32
    %c0_i32_0 = arith.constant 0 : i32
    %c0_i32_1 = arith.constant 0 : i32
    return %c0_i32, %c0_i32_0 : i32, i32
  }
  func.func @transform_3(%arg0: i32) -> (i32, i32) {
    %c0_i32 = arith.constant 0 : i32
    %c0_i32_0 = arith.constant 0 : i32
    %c0_i32_1 = arith.constant 0 : i32
    return %c0_i32, %c0_i32_0 : i32, i32
  }
  func.func @transform_4(%arg0: i32) -> (i32, i32) {
    %c0_i32 = arith.constant 0 : i32
    %c0_i32_0 = arith.constant 0 : i32
    %c0_i32_1 = arith.constant 0 : i32
    return %c0_i32, %c0_i32_0 : i32, i32
  }
  func.func @transform_5(%arg0: i32) -> (i32, i32) {
    %c0_i32 = arith.constant 0 : i32
    %c0_i32_0 = arith.constant 0 : i32
    return %arg0, %c0_i32 : i32, i32
  }
}

</mosaic_0001>

<bundles_post_ra>
// kernel: tpu_custom_call.1
= control target key start
LH: loop header
LB: loop body
LE: loop exit
PB: predicated region body
PF: predicated region fallthrough
CT: control target
= control target key end

     0   :  { %10 = vsyncpa [#allocation3], 0  ;;  %s1338_s0 = inlined_call_operand.hbm [shape: f32[16,128], index: 0, kind: input, shape index: {}]   ;;  %s1339_s1 = inlined_call_operand.hbm [shape: bf16[128,256], index: 1, kind: input, shape index: {}]   ;;  %s1340_s2 = inlined_call_operand.vmem [shape: f32[1,256], index: 2, kind: input, shape index: {}]   ;;  %s1341_s3 = inlined_call_operand.hbm [shape: bf16[256,128], index: 3, kind: input, shape index: {}]   ;;  %s1342_s4 = inlined_call_operand.vmem [shape: f32[1,128], index: 4, kind: input, shape index: {}]   ;;  %s1343_s5 = inlined_call_operand.hbm [shape: f32[16,128], index: 5, kind: output, shape index: {}]  }
   0x1   :  { %12 = vsyncpa [#allocation3 + $0x1], 0 }
   0x2   :  { %13 = vsyncpa [#allocation6], 0 }
   0x3   :  { %14 = vsyncpa [#allocation4], 0 }
   0x4   :  { %16 = vsyncpa [#allocation4 + $0x1], 0  ;;  %s1096_s18 = smov 0   ;;  %s1098_s19 = smov 0  }
   0x5   :  { %s1100_s20 = smov 0   ;;  %s1102_s21 = smov 0  }
   0x6 LB: > { %s1117_s22 = sadd.s32 4294967295, %s1055_s21   ;;  %s712_s23 = sadd.s32 4294967294, %s1055_s21   ;;  %s1055_s21 = sphi %s1102_s21, %s1363_s21   ;;  %s1051_s20 = sphi %s1100_s20, %s1362_s20   ;;  %s1047_s19 = sphi %s1098_s19, %s1361_s19   ;;  %s1043_s18 = sphi %s1096_s18, %s1360_s18  }
   0x7   : > { %p42_p0 = scmp.ne.s32.totalorder %s1047_s19, %s1043_s18  ;;  %p1344_p1 = scmp.eq.s32.totalorder %s1117_s22, 0 }
   0x8   : > { %p156_p3 = scmp.eq.s32.totalorder %s712_s23, 1  ;;  %p713_p5 = scmp.ge.s32.totalorder %s1055_s21, 1 }
   0x9   : > { %p1126_p4 = por %p1344_p1, %p42_p0  ;;  %p163_p7 = scmp.lt.s32.totalorder %s1055_s21, 3 }
   0xa   : > { %p1131_p6 = por %p156_p3, %p42_p0  ;;  %s1057_s27 = smov [#allocation5]  }
   0xb   : > { %s1347_s24 = scalar_select %p1126_p4, 1, 0 }
   0xc   : > { %s1348_s25 = scalar_select %p1131_p6, 1, 0 }
   0xd   : > { %p1136_p8 = pnand %p713_p5, %p163_p7  ;;  %s175_s28 = sshll.u32 %s1057_s27, 4  ;;  %s1140_s28 = int_to_ptr.vmem [resolvable:$true] %s175_s28 }
   0xe   : > { %s1058_s30 = smov [#allocation7]   ;;  %s899_s9 = scalar_lea.hbm %s1339_s1, 2048 }
   0xf   : > { %p795_p9 = pneg %p1136_p8  ;;  %s191_s6 = sshll.u32 %s1058_s30, 4  ;;  %s1151_s6 = int_to_ptr.vmem [resolvable:$true] %s191_s6 }
  0x10   : > { %p900_p12 = scmp.ne.s32.totalorder %s1339_s1, %s899_s9  ;;  %p906_p5 = scmp.lt.u32.totalorder %s899_s9, %s1339_s1 }
  0x11   : > { %p1147_p11 = pnand %p795_p9, %p1344_p1 }
  0x13   : > { %p901_p13 = pneg %p1147_p11 }
  0x15   : > { %p902_p0 = pnand %p901_p13, %p900_p12 }
  0x17   : > { %p903_p3 = pneg %p902_p0 }
  0x19   : > { %p908_p7 = pnand %p906_p5, %p903_p3 }
  0x1b   : > { %911 = shalt.err (!%p908_p7)
}
  0x1c   : > { %s912_s14 = scalar_lea.vmem %s1140_s28, 2048  ;;  %p920_p2 = scmp.lt.s32.totalorder %s1140_s28, %s1140_s28 }
  0x1d   : > { %p913_p9 = scmp.ne.s32.totalorder %s1140_s28, %s912_s14  ;;  %p921_p12 = scmp.lt.s32.totalorder %s912_s14, %s912_s14 }
  0x1f   : > { %p915_p10 = pnand %p913_p9, %p901_p13  ;;  %p922_p0 = por %p921_p12, %p920_p2 }
  0x21   : > { %p916_p1 = pneg %p915_p10 }
  0x23   : > { %p923_p6 = pnand %p922_p0, %p916_p1 }
  0x25   : > { %926 = shalt.err (!%p923_p6)
}
  0x26   : > { %s1059_s15 = smov 128   ;;  %s1060_s16 = smov 8  }
  0x27   : > { %798 = dma.hbm_to_vmem [thread:$0]  (!%p1147_p11), %s1339_s1, 2048, %s1140_s28, [#allocation6], %s1059_s15, %s1059_s15, %s1060_s16  }
  0x28   : > { %s927_s7 = scalar_lea.hbm %s1341_s3, 2048 }
  0x29   : > { %p928_p2 = scmp.ne.s32.totalorder %s1341_s3, %s927_s7  ;;  %p934_p10 = scmp.lt.u32.totalorder %s927_s7, %s1341_s3 }
  0x2b   : > { %p930_p1 = pnand %p928_p2, %p901_p13 }
  0x2d   : > { %p931_p6 = pneg %p930_p1 }
  0x2f   : > { %p936_p3 = pnand %p934_p10, %p931_p6 }
  0x31   : > { %939 = shalt.err (!%p936_p3)
}
  0x32   : > { %s940_s28 = scalar_lea.vmem %s1151_s6, 2048  ;;  %p948_p12 = scmp.lt.s32.totalorder %s1151_s6, %s1151_s6 }
  0x33   : > { %p941_p5 = scmp.ne.s32.totalorder %s1151_s6, %s940_s28  ;;  %p949_p0 = scmp.lt.s32.totalorder %s940_s28, %s940_s28 }
  0x35   : > { %p943_p7 = pnand %p941_p5, %p901_p13  ;;  %p950_p2 = por %p949_p0, %p948_p12 }
  0x37   : > { %p944_p9 = pneg %p943_p7 }
  0x39   : > { %p951_p1 = pnand %p950_p2, %p944_p9 }
  0x3b   : > { %954 = shalt.err (!%p951_p1)
}
  0x3c   : > { %s1061_s12 = smov 64   ;;  %s1062_s13 = smov 4  }
  0x3d   : > { %801 = dma.hbm_to_vmem [thread:$0]  (!%p1147_p11), %s1341_s3, 2048, %s1151_s6, [#allocation6], %s1061_s12, %s1061_s12, %s1062_s13  }
  0x3e   : > { %s1206_s16 = sadd.s32 1, %s1055_s21   ;;  %s29_s23 = sadd.s32 1, %s1051_s20 }
  0x3f   : > { %s26_s17 = ssub.s32 %s1055_s21, %s1206_s16  ;;  %p36_p6 = scmp.ne.s32.totalorder %s1051_s20, %s1047_s19 }
  0x40   : > { %p27_p13 = scmp.eq.s32.totalorder %s26_s17, 0  ;;  %p37_p10 = scmp.eq.s32.totalorder %s1055_s21, 0 }
  0x41   : > { %p1351_p5 = scmp.eq.s32.totalorder %s1117_s22, 1  ;;  %p812_p9 = scmp.lt.s32.totalorder %s1055_s21, 2 }
  0x42   : > { %s1215_s27 = scalar_select %p27_p13, %s1051_s20, %s29_s23  }
  0x43   : > { %p38_p3 = por %p37_p10, %p36_p6  ;;  %p1219_p7 = por %p1351_p5, %p36_p6 }
  0x44   : > { %s208_s29 = sand.u32 1, %s1051_s20   ;;  %s718_s6 = sshll.u32 %s1055_s21, 7 }
  0x45   : > { %s1352_s30 = scalar_select %p1219_p7, 1, 0 }
  0x46   : > { %s717_s7 = sshll.u32 %s208_s29, 3  ;;  %s1229_s10 = scalar_lea.hbm %s1338_s0, %s718_s6 }
  0x47   : > { %s212_s11 = scalar_lea.vmem [#allocation2], %s717_s7  ;;  %p1233_p11 = pnand %p812_p9, %p38_p3 }
  0x48   : > { %s219_s28 = sshll.u32 %s212_s11, 4  ;;  %s209_s13 = scalar_lea.sflag [#allocation3], %s208_s29  ;;  %s1231_s28 = int_to_ptr.vmem [resolvable:$true] %s219_s28 }
  0x49   : > { %s955_s14 = scalar_lea.hbm %s1229_s10, 128  ;;  %p957_p0 = pneg %p1233_p11 }
  0x4a   : > { %p956_p12 = scmp.ne.s32.totalorder %s1229_s10, %s955_s14  ;;  %s960_s23 = scalar_lea.hbm %s1338_s0, 256 }
  0x4b   : > { %p961_p13 = scmp.lt.u32.totalorder %s1229_s10, %s1338_s0  ;;  %p962_p6 = scmp.lt.u32.totalorder %s960_s23, %s955_s14 }
  0x4c   : > { %p958_p2 = pnand %p957_p0, %p956_p12  ;;  %p964_p3 = scmp.lt.u32.totalorder %s955_s14, %s1229_s10 }
  0x4d   : > { %p963_p10 = por %p962_p6, %p961_p13 }
  0x4e   : > { %p959_p1 = pneg %p958_p2 }
  0x4f   : > { %p965_p5 = por %p964_p3, %p963_p10 }
  0x51   : > { %p966_p9 = pnand %p965_p5, %p959_p1 }
  0x53   : > { %969 = shalt.err (!%p966_p9)
}
  0x54   : > { %s970_s29 = scalar_lea.vmem %s1231_s28, 128  ;;  %s1063_s8 = smov [#allocation2]  }
  0x55   : > { %p971_p12 = scmp.ne.s32.totalorder %s1231_s28, %s970_s29  ;;  %s975_s9 = sshll.u32 %s1063_s8, 4  ;;  %s976_s9 = int_to_ptr.vmem [resolvable:$false] %s975_s9 }
  0x56   : > { %s977_s11 = scalar_lea.vmem %s976_s9, 256  ;;  %p978_p4 = scmp.lt.s32.totalorder %s1231_s28, %s976_s9 }
  0x57   : > { %p973_p2 = pnand %p971_p12, %p957_p0  ;;  %p979_p13 = scmp.lt.s32.totalorder %s977_s11, %s970_s29 }
  0x59   : > { %p974_p7 = pneg %p973_p2  ;;  %p980_p6 = por %p979_p13, %p978_p4 }
  0x5b   : > { %p981_p10 = pnand %p980_p6, %p974_p7 }
  0x5d   : > { %984 = shalt.err (!%p981_p10)
}
  0x5e   : > { %805 = dma.hbm_to_vmem [thread:$0]  (!%p1233_p11), %s1229_s10, 128, %s1231_s28, %s209_s13  }
  0x5f   : > { %228 = sbr.rel (%p1136_p8) target bundleno = 605 (0x25d), region = 40  ;;  %s1265_s14 = sand.u32 (!%p1136_p8), 1, %s1047_s19  }
  0x60   : > { %s720_s15 = sshll.u32 (!%p1136_p8), %s1265_s14, 3  ;;  %s231_s17 = scalar_lea.sflag (!%p1136_p8), [#allocation3], %s1265_s14 }
  0x61   : > { %s1271_s23 = scalar_lea.vmem (!%p1136_p8), [#allocation2], %s720_s15  ;;  %p1354_p4 = scmp.ne.s32.totalorder (!%p1136_p8), %s1347_s24, 0 }
  0x66   : > { %1030 = dma.done.wait (%p1354_p4), %s231_s17, 128  }
  0x67   : > { %1032 = vsyncadd (%p1354_p4), %s231_s17, 4294967168  ;;  %p1355_p7 = scmp.eq.s32.totalorder %s1117_s22, 0 }
  0x69   : > { %1034 = dma.done.wait (%p1355_p7), [#allocation6], 4096   ;;  %p1356_p8 = pmov %p1355_p7 }
  0x6a   : > { %v1064_v0 = vmov 0   ;;  %v855_v1 = vld [vmem:[#allocation5 + $0x4] ss:$8 sps:$4 sm:$0xff]   ;;  %v857_v2 = vld [vmem:[#allocation5] ss:$8 sps:$4 sm:$0xff]   ;;  %v270_v21 = vld [vmem:[%s1271_s23] sm:$0xff]  ;;  %v290_v35 = vlaneseq }
  0x6b   : > { %1036 = vsyncadd (%p1356_p8), [#allocation6], 4294963200  ;;  %412 = vmatprep.mubr.bf16.mxu0 %v1064_v0  ;;  %380 = vmatprep.subr.bf16.mxu0 %v855_v1  ;;  %v858_v3 = vld [vmem:[#allocation5 + $0x14] ss:$8 sps:$4 sm:$0xff]   ;;  %v860_v4 = vld [vmem:[#allocation5 + $0x10] ss:$8 sps:$4 sm:$0xff]   ;;  %v271_v22 = vpack.c.bf16 %v270_v21, %v270_v21 }
  0x6c   : > { %381 = vmatpush1.bf16.msra.mxu0 %v857_v2  ;;  %v861_v5 = vld [vmem:[#allocation5 + $0x24] ss:$8 sps:$4 sm:$0xff]   ;;  %v863_v6 = vld [vmem:[#allocation5 + $0x20] ss:$8 sps:$4 sm:$0xff]   ;;  %v864_v7 = vld [vmem:[#allocation5 + $0x34] ss:$8 sps:$4 sm:$0xff]  }
  0x6d   : > { %382 = vmatprep.subr.bf16.mxu0 %v858_v3  ;;  %v866_v8 = vld [vmem:[#allocation5 + $0x30] ss:$8 sps:$4 sm:$0xff]   ;;  %v867_v9 = vld [vmem:[#allocation5 + $0x44] ss:$8 sps:$4 sm:$0xff]   ;;  %v869_v12 = vld [vmem:[#allocation5 + $0x40] ss:$8 sps:$4 sm:$0xff]  }
  0x6e   : > { %v879_v10 = vld [vmem:[#allocation7 + $0x40] sm:$0xff]   ;;  %v881_v13 = vld [vmem:[#allocation7 + $0x48] sm:$0xff]   ;;  %v870_v15 = vld [vmem:[#allocation5 + $0x54] ss:$8 sps:$4 sm:$0xff]   ;;  %v291_v36 = vshrl.u32 %v290_v35, 7  ;;  %s758_s12 = sshll.u32 %s1117_s22, 7 }
  0x6f   : > { %v880_v11 = vld [vmem:[#allocation7] sm:$0xff]   ;;  %761 = vmatprep.subr.bf16.mxu1 %v879_v10  ;;  %v882_v14 = vld [vmem:[#allocation7 + $0x8] sm:$0xff]   ;;  %v872_v16 = vld [vmem:[#allocation5 + $0x50] ss:$8 sps:$4 sm:$0xff]   ;;  %s268_s13 = scalar_lea.vmem [#allocation8], %s720_s15  ;;  %s1294_s8 = scalar_lea.hbm %s1343_s5, %s758_s12 }
  0x70   : > { %383 = vmatpush1.bf16.msra.mxu0 %v860_v4  ;;  %762 = vmatpush3.bf16.msra.mxu1 %v880_v11  ;;  %v873_v17 = vld [vmem:[#allocation5 + $0x64] ss:$8 sps:$4 sm:$0xff]   ;;  %v875_v18 = vld [vmem:[#allocation5 + $0x60] ss:$8 sps:$4 sm:$0xff]   ;;  %v876_v19 = vld [vmem:[#allocation5 + $0x74] ss:$8 sps:$4 sm:$0xff]  }
  0x71   : > { %384 = vmatprep.subr.bf16.mxu0 %v861_v5  ;;  %763 = vmatprep.subr.bf16.mxu1 %v881_v13  ;;  %v878_v20 = vld [vmem:[#allocation5 + $0x70] ss:$8 sps:$4 sm:$0xff]   ;;  %v887_v27 = vld [vmem:[#allocation7 + $0x60] sm:$0xff]   ;;  %v889_v29 = vld [vmem:[#allocation7 + $0x68] sm:$0xff]   ;;  %v292_v37 = vsub.s32 0, %v291_v36  ;;  %v296_v39 = vsub.s32 1, %v291_v36 }
  0x72   : > { %v883_v23 = vld [vmem:[#allocation7 + $0x50] sm:$0xff]   ;;  %v885_v25 = vld [vmem:[#allocation7 + $0x58] sm:$0xff]   ;;  %v888_v28 = vld [vmem:[#allocation7 + $0x20] sm:$0xff]   ;;  %s623_s7 = sshll.u32 %s268_s13, 4  ;;  %s610_s9 = scalar_lea.sflag [#allocation4], %s1265_s14  ;;  %s1296_s7 = int_to_ptr.vmem [resolvable:$true] %s623_s7 }
  0x73   : > { %v884_v24 = vld [vmem:[#allocation7 + $0x10] sm:$0xff]   ;;  %v886_v26 = vld [vmem:[#allocation7 + $0x18] sm:$0xff]   ;;  %v890_v30 = vld [vmem:[#allocation7 + $0x28] sm:$0xff]   ;;  %s985_s22 = scalar_lea.vmem %s1296_s7, 128  ;;  %p1357_p0 = scmp.ne.s32.totalorder %s1352_s30, 0 }
  0x74   : > { %385 = vmatpush1.bf16.msra.mxu0 %v863_v6  ;;  %764 = vmatpush3.bf16.msra.mxu1 %v882_v14  ;;  %v891_v31 = vld [vmem:[#allocation7 + $0x70] sm:$0xff]   ;;  %v893_v33 = vld [vmem:[#allocation7 + $0x78] sm:$0xff]   ;;  %p986_p11 = scmp.ne.s32.totalorder %s1296_s7, %s985_s22  ;;  %s1065_s11 = smov [#allocation8]  }
  0x75   : > { %386 = vmatprep.subr.bf16.mxu0 %v864_v7  ;;  %765 = vmatprep.subr.bf16.mxu1 %v883_v23  ;;  %v892_v32 = vld [vmem:[#allocation7 + $0x30] sm:$0xff]   ;;  %v894_v34 = vld [vmem:[#allocation7 + $0x38] sm:$0xff]   ;;  %s989_s15 = sshll.u32 %s1065_s11, 4  ;;  %s990_s15 = int_to_ptr.vmem [resolvable:$false] %s989_s15 }
  0x76   : > { %v288_v38 = vld [vmem:[%s1340_s2] sm:$0x3]  ;;  %p987_p1 = pnand %p986_p11, %p1357_p0  ;;  %s991_s17 = scalar_lea.vmem %s990_s15, 256 }
  0x77   : > { %v293_v40 = vrot.slane %v288_v38, %v292_v37  ;;  %v297_v41 = vrot.slane %v288_v38, %v296_v39  ;;  %v740_v61 = vld [vmem:[%s1342_s4] ss:$0 sm:$0xff]  ;;  %p992_p5 = scmp.lt.s32.totalorder %s1296_s7, %s990_s15  ;;  %p993_p9 = scmp.lt.s32.totalorder %s991_s17, %s985_s22 }
  0x78   : > { %387 = vmatpush1.bf16.msra.mxu0 %v866_v8  ;;  %766 = vmatpush3.bf16.msra.mxu1 %v884_v24  ;;  %p988_p3 = pneg %p987_p1 }
  0x79   : > { %388 = vmatprep.subr.bf16.mxu0 %v867_v9  ;;  %767 = vmatprep.subr.bf16.mxu1 %v885_v25  ;;  %p994_p12 = por %p993_p9, %p992_p5 }
  0x7b   : > { %p995_p2 = pnand %p994_p12, %p988_p3 }
  0x7c   : > { %389 = vmatpush1.bf16.msra.mxu0 %v869_v12  ;;  %768 = vmatpush3.bf16.msra.mxu1 %v886_v26 }
  0x7d   : > { %390 = vmatprep.subr.bf16.mxu0 %v870_v15  ;;  %769 = vmatprep.subr.bf16.mxu1 %v887_v27 }
  0x80   : > { %391 = vmatpush1.bf16.msra.mxu0 %v872_v16  ;;  %770 = vmatpush3.bf16.msra.mxu1 %v888_v28 }
  0x81   : > { %392 = vmatprep.subr.bf16.mxu0 %v873_v17  ;;  %771 = vmatprep.subr.bf16.mxu1 %v889_v29 }
  0x84   : > { %393 = vmatpush1.bf16.msra.mxu0 %v875_v18  ;;  %772 = vmatpush3.bf16.msra.mxu1 %v890_v30 }
  0x85   : > { %394 = vmatprep.subr.bf16.mxu0 %v876_v19  ;;  %773 = vmatprep.subr.bf16.mxu1 %v891_v31 }
  0x88   : > { %395 = vmatpush1.bf16.msra.mxu0 %v878_v20  ;;  %774 = vmatpush3.bf16.msra.mxu1 %v892_v32 }
  0x89   : > { %775 = vmatprep.subr.bf16.mxu1 %v893_v33 }
  0x8b   : > { %413 = vmatmul.mubr.bf16.vlgmr.msra.gmra.mrb[0].mxu0 %v271_v22 }
  0x8c   : > { %776 = vmatpush3.bf16.msra.mxu1 %v894_v34 }
 0x15e   : > { %v414_v42 = vpop.f32.mrb[0].mxu0 }
 0x15f   : > { %v415_v43 = vadd.f32 %v414_v42, %v293_v40  ;;  %v416_v44 = vpop.f32.mrb[1].mxu0 }
 0x160   : > { %v417_v45 = vadd.f32 %v416_v44, %v297_v41  ;;  %v418_v46 = vpop.f32.mrb[2].mxu0 }
 0x161   : > { %v423_v47 = vmul.f32 0.70710677, %v415_v43  ;;  %v419_v48 = vpop.f32.mrb[3].mxu0  ;;  %v421_v52 = vmul.f32 0.5, %v415_v43 }
 0x162   : > { %v424_v49 = vmul.f32 0.70710677, %v417_v45  ;;  %v422_v54 = vmul.f32 0.5, %v417_v45 }
 0x163   : > { %895 = verf.f32 %v423_v47 }
 0x164   : > { %897 = verf.f32 %v424_v49 }
 0x16d   : > { %v896_v50 = vpop.eup %895 }
 0x16e   : > { %v898_v51 = vpop.eup %897  ;;  %v427_v53 = vadd.f32 1.0, %v896_v50 }
 0x16f   : > { %v428_v55 = vadd.f32 1.0, %v898_v51 }
 0x170   : > { %v429_v56 = vmul.f32 %v427_v53, %v421_v52 }
 0x171   : > { %v430_v57 = vmul.f32 %v428_v55, %v422_v54 }
 0x172   : > { %v431_v59 = vpack.c.bf16 %v429_v56, %v429_v56 }
 0x173   : > { %v432_v58 = vpack.c.bf16 %v430_v57, %v430_v57 }
 0x175   : > { %600 = vmatprep.mubr.bf16.mxu1 %v432_v58 }
 0x176   : > { %601 = vmatmul.mubr.bf16.vlgmr.msra.gmra.mrb[0].mxu1 %v431_v59 }
 0x249   : > { %v777_v60 = vpop.f32.mrb[0].mxu1 }
 0x24a   : > { %v778_v62 = vpop.f32.mrb[1].mxu1 }
 0x24b   : > { %v779_v63 = vadd.f32 %v778_v62, %v777_v60  ;;  %v780_v0 = vpop.f32.mrb[2].mxu1 }
 0x24c   : > { %v781_v1 = vpop.f32.mrb[3].mxu1 }
 0x24d   : > { %v603_v2 = vadd.f32 %v779_v63, %v740_v61 }
 0x24f   : > { %608 = vst [vmem:[%s268_s13] sm:$0xff] %v603_v2 }
 0x250   : > { %998 = shalt.err (!%p995_p2)
}
 0x251   : > { %s999_s14 = scalar_lea.hbm %s1294_s8, 128  ;;  %s1003_s26 = scalar_lea.hbm %s1343_s5, 256 }
 0x252   : > { %p1000_p13 = scmp.ne.s32.totalorder %s1294_s8, %s999_s14  ;;  %p1004_p4 = scmp.lt.u32.totalorder %s1294_s8, %s1343_s5 }
 0x253   : > { %p1005_p7 = scmp.lt.u32.totalorder %s1003_s26, %s999_s14  ;;  %p1007_p11 = scmp.lt.u32.totalorder %s999_s14, %s1294_s8 }
 0x254   : > { %p1001_p6 = pnand %p1000_p13, %p1357_p0 }
 0x255   : > { %p1006_p8 = por %p1005_p7, %p1004_p4 }
 0x256   : > { %p1002_p10 = pneg %p1001_p6 }
 0x257   : > { %p1008_p1 = por %p1007_p11, %p1006_p8 }
 0x259   : > { %p1009_p3 = pnand %p1008_p1, %p1002_p10 }
 0x25b   : > { %1012 = shalt.err (!%p1009_p3)
}
 0x25c   : > { %793 = dma.vmem_to_hbm [thread:$0]  (%p1357_p0), %s1296_s7, 128, %s1294_s8, %s610_s9  }
 0x25d PF: > { %s635_s12 = sand.u32 1, %s1043_s18   ;;  %p1358_p5 = scmp.ne.s32.totalorder %s1348_s25, 0 }
 0x25e   : > { %p1359_p9 = scmp.ge.s32.totalorder %s1055_s21, 2  ;;  %s636_s13 = scalar_lea.sflag [#allocation4], %s635_s12 }
 0x260   : > { %p807_p12 = pnand %p1359_p9, %p1358_p5 }
 0x262   : > { %1038 = dma.done.wait (!%p807_p12), %s636_s13, 128  }
 0x263   : > { %1040 = vsyncadd (!%p807_p12), %s636_s13, 4294967168  ;;  %p19_p2 = scmp.ge.s32.totalorder %s1206_s16, 4   ;;  %s1360_s18 = smov %s1047_s19 }
 0x264   : > { %s1361_s19 = smov %s1051_s20  ;;  %s1362_s20 = smov %s1215_s27 }
 0x265   : > { %s1363_s21 = smov %s1206_s16  ;;  %21 = sbr.rel (!%p19_p2) target bundleno = 6 (0x6), region = 93 }
 0x26c   :  { %641 = vsyncpa [#allocation3], 1 }
 0x26d   :  { %643 = vsyncpa [#allocation3 + $0x1], 1 }
 0x26e   :  { %644 = vsyncpa [#allocation6], 1 }
 0x26f   :  { %645 = vsyncpa [#allocation4], 1 }
 0x270   :  { %647 = vsyncpa [#allocation4 + $0x1], 1 }

</bundles_post_ra>
